<compile_context>
chip_gen: v7x
topology: tpu7x:2x2x1
jax: 0.10.0
libtpu: 0.0.40
codegen_flags: <defaults>
</compile_context>

<pallas_src>
import functools

import jax
import jax.numpy as jnp
from jax.experimental import pallas as pl
from jax.experimental.pallas import tpu as pltpu


def _round_up(x, m):
    return ((x + m - 1) // m) * m


# ---------------------------------------------------------------------------
# Per-generation configuration (tile sizes + VMEM budget).
# ---------------------------------------------------------------------------
def _hw_config():
    kind = ""
    try:
        kind = jax.devices()[0].device_kind.lower()
    except Exception:
        pass
    vmem_cap = None
    try:
        vmem_cap = int(pltpu.get_tpu_info().vmem_capacity_bytes)
    except Exception:
        pass

    mib = 1024 * 1024
    small_vmem = vmem_cap is not None and vmem_cap <= 80 * mib
    if "v7" in kind or small_vmem:
        # v7x: 64 MiB VMEM per TC, 2 TCs/chip, highest HBM bandwidth.
        return dict(tm=1024, tn=2048, tk=512, vmem_limit=56 * mib, num_cores=2)
    if "v6" in kind:
        # v6e: worst MXU:HBM ratio -> big resident output tile; 128 MiB VMEM.
        return dict(tm=1024, tn=2048, tk=1024, vmem_limit=96 * mib, num_cores=1)
    if "v5" in kind:
        # v5e: 512x512 already reaches the HBM roofline; keep the acc small.
        return dict(tm=512, tn=512, tk=1024, vmem_limit=96 * mib, num_cores=1)
    # Unknown generation / interpret mode: conservative middle ground.
    return dict(tm=512, tn=1024, tk=1024, vmem_limit=32 * mib, num_cores=1)


_HW = _hw_config()


def _choose_tn_tk(out_dim, in_dim):
    tn = min(_HW["tn"], _round_up(out_dim, 128))
    tk = min(_HW["tk"], _round_up(in_dim, 128))
    return tn, tk


def _choose_tm(m):
    base = _HW["tm"]
    if m <= base:
        return max(_round_up(m, 8), 8)
    # Pick the candidate minimizing M padding waste (ties -> larger tile).
    cands = sorted({base, base // 2, base // 4, 256, 128}, reverse=True)
    best, best_waste = None, None
    for c in cands:
        if c < 128:
            continue
        waste = _round_up(m, c) - m
        if best is None or waste < best_waste:
            best, best_waste = c, waste
    return best


# ---------------------------------------------------------------------------
# Kernels.
# ---------------------------------------------------------------------------
def _linear_kernel_single(x_ref, w_ref, b_ref, o_ref):
    """K fits in one tile: no accumulator scratch, no K grid axis."""
    o_ref[...] = (
        jnp.dot(x_ref[...], w_ref[...], preferred_element_type=jnp.float32)
        + b_ref[...]
    ).astype(o_ref.dtype)


def _linear_kernel_acc(x_ref, w_ref, b_ref, o_ref, acc_ref):
    """Tiled K: float32 VMEM accumulator; init on k==0, bias+store on last k."""
    k = pl.program_id(2)

    @pl.when(k == 0)
    def _():
        acc_ref[...] = jnp.zeros_like(acc_ref)

    acc_ref[...] += jnp.dot(
        x_ref[...], w_ref[...], preferred_element_type=jnp.float32
    )

    @pl.when(k == pl.num_programs(2) - 1)
    def _():
        o_ref[...] = (acc_ref[...] + b_ref[...]).astype(o_ref.dtype)


# ---------------------------------------------------------------------------
# Parameter preparation (one-time, hoisted out of the per-call hot path).
# ---------------------------------------------------------------------------
def prepare_linear_params(weight, bias=None, compute_dtype=jnp.bfloat16):
    """Transpose to (in_dim, out_dim), cast to the MXU operand dtype, pad.

    weight: (out_dim, in_dim)  -- PyTorch nn.Linear layout.
    Returns (w_prep, b_prep, out_dim, in_dim) where
      w_prep: (k_pad, n_pad) compute_dtype
      b_prep: (1, n_pad)     float32
    NOTE: default compute_dtype=bfloat16 changes numerics vs a pure-f32
    reference (f32 accumulation is kept); pass jnp.float32 for exactness.
    """
    out_dim, in_dim = weight.shape
    tn, tk = _choose_tn_tk(out_dim, in_dim)
    n_pad, k_pad = _round_up(out_dim, tn), _round_up(in_dim, tk)

    w = jnp.asarray(weight).T.astype(compute_dtype)          # (in_dim, out_dim)
    if (k_pad, n_pad) != (in_dim, out_dim):
        w = jnp.pad(w, ((0, k_pad - in_dim), (0, n_pad - out_dim)))
    if bias is None:
        b = jnp.zeros((1, n_pad), jnp.float32)
    else:
        b = jnp.asarray(bias).reshape(1, out_dim).astype(jnp.float32)
        if n_pad != out_dim:
            b = jnp.pad(b, ((0, 0), (0, n_pad - out_dim)))
    return w, b, out_dim, in_dim
    # TODO(synk): optional quantized weight path (int8 on v5e/v6e, fp8 on v7x)
    # for weight-bandwidth-bound small-M regimes.


# ---------------------------------------------------------------------------
# Hot path.
# ---------------------------------------------------------------------------
@functools.partial(jax.jit, static_argnames=("out_dim", "in_dim", "dropout"))
def linear_apply(x, w_prep, b_prep, *, out_dim, in_dim, dropout=-1.0):
    """y = x @ W^T + b using pre-prepared (transposed/cast/padded) params."""
    if dropout > 0:
        # TODO(synk): training-mode Bernoulli dropout (pltpu.prng_*) not
        # implemented; the reference module is used with dropout=-1.0.
        raise NotImplementedError("dropout > 0 not implemented in Pallas path")

    assert x.shape[-1] == in_dim
    lead_shape = x.shape[:-1]
    m = 1
    for d in lead_shape:
        m *= d

    out_dtype = x.dtype
    cdt = w_prep.dtype
    k_pad, n_pad = w_prep.shape
    tn, tk = _choose_tn_tk(out_dim, in_dim)
    tm = _choose_tm(m)
    m_pad = _round_up(m, tm)

    # v7x megacore: if the whole problem is one output tile, split N so both
    # TensorCores get a parallel program (tn stays a 128-multiple dividing n_pad).
    if (_HW["num_cores"] > 1
            and (m_pad // tm) * (n_pad // tn) == 1
            and tn % 256 == 0):
        tn //= 2

    x2d = x.reshape(m, in_dim).astype(cdt)
    if (m_pad, k_pad) != (m, in_dim):
        x2d = jnp.pad(x2d, ((0, m_pad - m), (0, k_pad - in_dim)))

    grid_m, grid_n, grid_k = m_pad // tm, n_pad // tn, k_pad // tk

    flops = 2 * m_pad * n_pad * k_pad
    bytes_accessed = (
        m_pad * k_pad * jnp.dtype(cdt).itemsize * grid_n      # x streamed per N tile
        + k_pad * n_pad * jnp.dtype(cdt).itemsize * grid_m    # w streamed per M tile
        + n_pad * 4
        + m_pad * n_pad * jnp.dtype(out_dtype).itemsize
    )
    cost = pl.CostEstimate(
        flops=flops, transcendentals=0, bytes_accessed=bytes_accessed)

    if grid_k == 1:
        out2d = pl.pallas_call(
            _linear_kernel_single,
            out_shape=jax.ShapeDtypeStruct((m_pad, n_pad), out_dtype),
            grid_spec=pltpu.PrefetchScalarGridSpec(
                num_scalar_prefetch=0,
                grid=(grid_m, grid_n),
                in_specs=[
                    pl.BlockSpec((tm, tk), lambda i, j: (i, 0)),   # x
                    pl.BlockSpec((tk, tn), lambda i, j: (0, j)),   # W^T (prepped)
                    pl.BlockSpec((1, tn), lambda i, j: (0, j)),    # bias
                ],
                out_specs=pl.BlockSpec((tm, tn), lambda i, j: (i, j)),
            ),
            compiler_params=pltpu.CompilerParams(
                dimension_semantics=("parallel", "parallel"),
                vmem_limit_bytes=_HW["vmem_limit"],
            ),
            cost_estimate=cost,
        )(x2d, w_prep, b_prep)
    else:
        out2d = pl.pallas_call(
            _linear_kernel_acc,
            out_shape=jax.ShapeDtypeStruct((m_pad, n_pad), out_dtype),
            grid_spec=pltpu.PrefetchScalarGridSpec(
                num_scalar_prefetch=0,
                grid=(grid_m, grid_n, grid_k),
                in_specs=[
                    pl.BlockSpec((tm, tk), lambda i, j, k: (i, k)),   # x
                    pl.BlockSpec((tk, tn), lambda i, j, k: (k, j)),   # W^T (prepped)
                    pl.BlockSpec((1, tn), lambda i, j, k: (0, j)),    # bias
                ],
                out_specs=pl.BlockSpec((tm, tn), lambda i, j, k: (i, j)),
                scratch_shapes=[pltpu.VMEM((tm, tn), jnp.float32)],
            ),
            compiler_params=pltpu.CompilerParams(
                dimension_semantics=("parallel", "parallel", "arbitrary"),
                vmem_limit_bytes=_HW["vmem_limit"],
            ),
            cost_estimate=cost,
        )(x2d, w_prep, b_prep)

    out2d = out2d[:m, :out_dim]
    return out2d.reshape(*lead_shape, out_dim)


def linear_layer(x, weight, bias=None, dropout=-1.0, compute_dtype=jnp.bfloat16):
    """Convenience drop-in (prepares params per call; prefer prepare + apply)."""
    w_prep, b_prep, out_dim, in_dim = prepare_linear_params(
        weight, bias, compute_dtype=compute_dtype)
    return linear_apply(x, w_prep, b_prep, out_dim=out_dim, in_dim=in_dim,
                        dropout=dropout)


if __name__ == "__main__":
    key = jax.random.PRNGKey(0)
    k_x, k_w, k_b, k_x2, k_w2, k_b2 = jax.random.split(key, 6)

    # --- LinearLayer(32, 32) on a (2, 8, 32) input (matches module usage) ---
    batch, seq, in_dim, out_dim = 2, 8, 32, 32
    bound = 1.0 / (in_dim ** 0.5)
    weight = jax.random.uniform(k_w, (out_dim, in_dim), jnp.float32, -bound, bound)
    bias = jax.random.uniform(k_b, (out_dim,), jnp.float32, -bound, bound)
    x = jax.random.normal(k_x, (batch, seq, in_dim), jnp.float32)
    ref = x @ weight.T + bias

    # Hot path: params prepared once (bf16 MXU operands, f32 accumulation).
    w_prep, b_prep, od, idim = prepare_linear_params(weight, bias)
    out = jax.block_until_ready(
        linear_apply(x, w_prep, b_prep, out_dim=od, in_dim=idim, dropout=-1.0))
    assert out.shape == (batch, seq, out_dim)
    assert out.dtype == x.dtype
    assert jnp.allclose(out, ref, atol=5e-2, rtol=5e-2)

    # Exact f32 compute path (opt-in) -> tight tolerance.
    w32, b32, od, idim = prepare_linear_params(
        weight, bias, compute_dtype=jnp.float32)
    out32 = jax.block_until_ready(
        linear_apply(x, w32, b32, out_dim=od, in_dim=idim, dropout=-1.0))
    assert jnp.allclose(out32, ref, atol=1e-5, rtol=1e-5)

    # Larger K to exercise the tiled-K accumulator kernel (still small M/N).
    in2, out2, m2 = 1536, 32, 16
    bound2 = 1.0 / (in2 ** 0.5)
    weight2 = jax.random.uniform(k_w2, (out2, in2), jnp.float32, -bound2, bound2)
    bias2 = jax.random.uniform(k_b2, (out2,), jnp.float32, -bound2, bound2)
    x2 = jax.random.normal(k_x2, (m2, in2), jnp.float32)
    ref2 = x2 @ weight2.T + bias2
    out2_ = jax.block_until_ready(linear_layer(x2, weight2, bias2, dropout=-1.0))
    assert out2_.shape == (m2, out2)
    assert jnp.allclose(out2_, ref2, atol=5e-2, rtol=5e-2)

    print("KERNEL_OK")
</pallas_src>

<mosaic_0001>
module attributes {stable_mosaic.version = 11 : i64} {
  func.func @_linear_kernel_single(%arg0: i32, %arg1: i32, %arg2: memref<16x128xbf16, #tpu.memory_space<vmem>>, %arg3: memref<128x128xbf16, #tpu.memory_space<vmem>>, %arg4: memref<1x128xf32, #tpu.memory_space<vmem>>, %arg5: memref<16x128xf32, #tpu.memory_space<vmem>>) attributes {dimension_semantics = [#tpu.dimension_semantics<parallel>, #tpu.dimension_semantics<parallel>], iteration_bounds = array<i64: 1, 1>, scalar_prefetch = 0 : i64, scratch_operands = 0 : i64, tpu.core_type = #tpu.core_type<tc>, window_params = [{transform_indices = @transform_0, window_bounds = array<i64: 16, 128>}, {transform_indices = @transform_1, window_bounds = array<i64: 128, 128>}, {transform_indices = @transform_2, window_bounds = array<i64: 1, 128>}, {transform_indices = @transform_3, window_bounds = array<i64: 16, 128>}]} {
    %c0 = arith.constant 0 : index
    %c0_0 = arith.constant 0 : index
    %0 = vector.load %arg2[%c0, %c0_0] : memref<16x128xbf16, #tpu.memory_space<vmem>>, vector<16x128xbf16>
    %c0_1 = arith.constant 0 : index
    %c0_2 = arith.constant 0 : index
    %1 = vector.load %arg3[%c0_1, %c0_2] : memref<128x128xbf16, #tpu.memory_space<vmem>>, vector<128x128xbf16>
    %cst = arith.constant dense<0.000000e+00> : vector<16x128xf32>
    %2 = tpu.matmul %0, %1, %cst {dimension_numbers = #tpu.dot_dimension_numbers<[1], [0], [0], [1], [0, 0, 1, 1], [], []>} : vector<16x128xbf16>, vector<128x128xbf16>, vector<16x128xf32> -> vector<16x128xf32>
    %c0_3 = arith.constant 0 : index
    %c0_4 = arith.constant 0 : index
    %3 = vector.load %arg4[%c0_3, %c0_4] : memref<1x128xf32, #tpu.memory_space<vmem>>, vector<1x128xf32>
    %4 = vector.broadcast %3 : vector<1x128xf32> to vector<16x128xf32>
    %5 = arith.addf %2, %4 : vector<16x128xf32>
    %c0_5 = arith.constant 0 : index
    %c0_6 = arith.constant 0 : index
    %6 = vector.load %arg5[%c0_5, %c0_6] : memref<16x128xf32, #tpu.memory_space<vmem>>, vector<16x128xf32>
    tpu.vector_store %arg5[%c0_5, %c0_6], %5 {strides = array<i32>} : memref<16x128xf32, #tpu.memory_space<vmem>>, vector<16x128xf32>,
    return
  }
  func.func @transform_0(%arg0: i32, %arg1: i32) -> (i32, i32) {
    %c0_i32 = arith.constant 0 : i32
    %c0_i32_0 = arith.constant 0 : i32
    return %arg0, %c0_i32 : i32, i32
  }
  func.func @transform_1(%arg0: i32, %arg1: i32) -> (i32, i32) {
    %c0_i32 = arith.constant 0 : i32
    %c0_i32_0 = arith.constant 0 : i32
    return %c0_i32, %arg1 : i32, i32
  }
  func.func @transform_2(%arg0: i32, %arg1: i32) -> (i32, i32) {
    %c0_i32 = arith.constant 0 : i32
    %c0_i32_0 = arith.constant 0 : i32
    return %c0_i32, %arg1 : i32, i32
  }
  func.func @transform_3(%arg0: i32, %arg1: i32) -> (i32, i32) {
    %c0_i32 = arith.constant 0 : i32
    return %arg0, %arg1 : i32, i32
  }
}

</mosaic_0001>

<bundles_post_ra>
// kernel: linear_apply.1
= control target key start
LH: loop header
LB: loop body
LE: loop exit
PB: predicated region body
PF: predicated region fallthrough
CT: control target
= control target key end

     0   :  { %8 = vsyncpa [#allocation3], 0  ;;  %s233_s12 = smov [#allocation2]   ;;  %s282_s0 = inlined_call_operand.vmem [shape: bf16[16,128], index: 0, kind: input, shape index: {}]   ;;  %s283_s1 = inlined_call_operand.hbm [shape: bf16[128,128], index: 1, kind: input, shape index: {}]   ;;  %s284_s2 = inlined_call_operand.vmem [shape: f32[1,128], index: 2, kind: input, shape index: {}]   ;;  %s285_s3 = inlined_call_operand.vmem [shape: f32[16,128], index: 3, kind: output, shape index: {}]  }
   0x1   :  { %s16_s13 = sshll.u32 %s233_s12, 4  ;;  %s209_s16 = scalar_lea.hbm %s283_s1, 1024  ;;  %s17_s13 = int_to_ptr.vmem [resolvable:$true] %s16_s13 }
   0x2   :  { %p210_p0 = scmp.ne.s32.totalorder %s283_s1, %s209_s16  ;;  %p213_p1 = scmp.lt.u32.totalorder %s209_s16, %s283_s1 }
   0x4   :  { %p215_p2 = pnand %p213_p1, %p210_p0 }
   0x6   :  { %218 = shalt.err (!%p215_p2)
}
   0x7   :  { %s219_s21 = scalar_lea.vmem %s17_s13, 1024  ;;  %p224_p4 = scmp.lt.s32.totalorder %s17_s13, %s17_s13 }
   0x8   :  { %p220_p3 = scmp.ne.s32.totalorder %s17_s13, %s219_s21  ;;  %p225_p5 = scmp.lt.s32.totalorder %s219_s21, %s219_s21 }
   0xa   :  { %p226_p6 = por %p225_p5, %p224_p4 }
   0xc   :  { %p227_p7 = pnand %p226_p6, %p220_p3 }
   0xe   :  { %230 = shalt.err (!%p227_p7)
}
   0xf   :  { %s234_s22 = smov 64   ;;  %s235_s23 = smov 4  }
  0x10   :  { %22 = dma.hbm_to_vmem [thread:$0]  %s283_s1, 1024, %s17_s13, [#allocation3], %s234_s22, %s234_s22, %s235_s23  }
  0x11   :  { %231 = dma.done.wait [#allocation3], 1024  }
  0x12   :  { %232 = vsyncadd [#allocation3], 4294966272  ;;  %v236_v0 = vmov 0.0   ;;  %vm237_vm0 = vmmov 0   ;;  %v200_v1 = vld [vmem:[#allocation2] sm:$0xff]   ;;  %v201_v2 = vld [vmem:[#allocation2 + $0x8] sm:$0xff]  }
  0x13   :  { %175 = vmatprep.subr.bf16.mxu0 %v236_v0  ;;  %191 = vmatprep.mubr.msk.bf16.mxu0 %vm237_vm0, %v236_v0  ;;  %v202_v3 = vld [vmem:[#allocation2 + $0x10] sm:$0xff]   ;;  %v203_v4 = vld [vmem:[#allocation2 + $0x18] sm:$0xff]   ;;  %v204_v5 = vld [vmem:[#allocation2 + $0x20] sm:$0xff]  }
  0x14   :  { %176 = vmatpush3.bf16.msra.mxu0 %v200_v1  ;;  %v205_v6 = vld [vmem:[#allocation2 + $0x28] sm:$0xff]   ;;  %v206_v7 = vld [vmem:[#allocation2 + $0x30] sm:$0xff]   ;;  %v207_v8 = vld [vmem:[#allocation2 + $0x38] sm:$0xff]  }
  0x15   :  { %177 = vmatprep.subr.bf16.mxu0 %v236_v0  ;;  %v208_v9 = vld [vmem:[%s282_s0] sm:$0xff]  }
  0x16   :  { %v156_v10 = vld [vmem:[%s284_s2] ss:$0 sm:$0xff] }
  0x18   :  { %178 = vmatpush3.bf16.msra.mxu0 %v201_v2 }
  0x19   :  { %179 = vmatprep.subr.bf16.mxu0 %v236_v0 }
  0x1c   :  { %180 = vmatpush3.bf16.msra.mxu0 %v202_v3 }
  0x1d   :  { %181 = vmatprep.subr.bf16.mxu0 %v236_v0 }
  0x20   :  { %182 = vmatpush3.bf16.msra.mxu0 %v203_v4 }
  0x21   :  { %183 = vmatprep.subr.bf16.mxu0 %v236_v0 }
  0x24   :  { %184 = vmatpush3.bf16.msra.mxu0 %v204_v5 }
  0x25   :  { %185 = vmatprep.subr.bf16.mxu0 %v236_v0 }
  0x28   :  { %186 = vmatpush3.bf16.msra.mxu0 %v205_v6 }
  0x29   :  { %187 = vmatprep.subr.bf16.mxu0 %v236_v0 }
  0x2c   :  { %188 = vmatpush3.bf16.msra.mxu0 %v206_v7 }
  0x2d   :  { %189 = vmatprep.subr.bf16.mxu0 %v236_v0 }
  0x30   :  { %190 = vmatpush3.bf16.msra.mxu0 %v207_v8 }
  0x33   :  { %192 = vmatmul.mubr.bf16.vlgmr.msra.gmra.mrb[0].mxu0 %v208_v9 }
 0x106   :  { %v142_v11 = vpop.f32.mrb[0].mxu0 }
 0x107   :  { %v143_v12 = vadd.f32 %v156_v10, %v142_v11  ;;  %v193_v13 = vpop.f32.mrb[1].mxu0 }
 0x108   :  { %v145_v14 = vpop.f32.mrb[2].mxu0 }
 0x109   :  { %149 = vst [vmem:[%s285_s3] sm:$0xff] %v143_v12  ;;  %v146_v15 = vadd.f32 %v156_v10, %v145_v14  ;;  %v194_v16 = vpop.f32.mrb[3].mxu0 }
 0x10b   :  { %150 = vst [vmem:[%s285_s3 + $0x8] sm:$0xff] %v146_v15 }
 0x10c   :  { %155 = vsyncpa [#allocation3], 1 }

</bundles_post_ra>
